<compile_context>
chip_gen: v6e
topology: v6e:2x2x1
jax: 0.10.0
libtpu: 0.0.40
codegen_flags: <defaults>
</compile_context>

<pallas_src>
import functools
import math
from typing import NamedTuple

import jax
import jax.numpy as jnp
from jax.experimental import pallas as pl
from jax.experimental.pallas import tpu as pltpu

LANE = 128                        # lane tile
ROW_TILE = 16                     # bf16 sublane tile (rows)
_RESIDENT_WIE_BYTES = 2 << 20     # keep w_ie fully resident (grid=(1,)) below this
_TARGET_STEP_BYTES = 2 << 20      # ~2 MiB of bf16 w_ie streamed per grid step


def _round_up(x, m):
    return ((x + m - 1) // m) * m


class Plan(NamedTuple):
    batch: int
    img_dim: int
    d_q: int
    n_answers: int
    b_pad: int
    k_pad: int
    tk: int
    hi_pad: int
    dq_pad: int
    hq_pad: int
    i_pad: int
    na_pad: int


def make_plan(*, batch, img_dim, h_img, d_q, h_q, inter, n_answers):
    """Single source of truth for tile / padding sizes (static)."""
    b_pad = _round_up(max(batch, ROW_TILE), ROW_TILE)
    hi_pad = _round_up(h_img, LANE)
    dq_pad = _round_up(d_q, LANE)
    hq_pad = _round_up(h_q, LANE)
    i_pad = _round_up(inter, LANE)
    na_pad = _round_up(n_answers, LANE)
    k_lane = _round_up(img_dim, LANE)
    if k_lane * hi_pad * 2 <= _RESIDENT_WIE_BYTES:
        tk, k_pad = k_lane, k_lane            # single grid step, weight resident
    else:
        # ~2 MiB bf16 w_ie per step, at least ~4 steps so DMA >> per-step overhead
        tk = max(LANE, (_TARGET_STEP_BYTES // (hi_pad * 2)) // LANE * LANE)
        tk = min(tk, max(LANE, (k_lane // 4) // LANE * LANE))
        k_pad = _round_up(k_lane, tk)
    return Plan(batch=batch, img_dim=img_dim, d_q=d_q, n_answers=n_answers,
                b_pad=b_pad, k_pad=k_pad, tk=tk, hi_pad=hi_pad, dq_pad=dq_pad,
                hq_pad=hq_pad, i_pad=i_pad, na_pad=na_pad)


# ------------------------------- Pallas kernel ------------------------------ #
def vqa_kernel(img_ref, wie_ref, qemb_ref, wqe_ref,          # streamed / resident
               bie_ref, bqe_ref, b1_ref, b2_ref,              # pre-broadcast biases
               w1i_hbm, w1q_hbm, w2_hbm,                      # tail weights (HBM)
               out_ref,
               acc_ref, qpool_ref, w1i_buf, w1q_buf, w2_buf, dma_sems):
    k = pl.program_id(0)
    n_k = pl.num_programs(0)

    def tail_copies():
        return (pltpu.make_async_copy(w1i_hbm, w1i_buf, dma_sems.at[0]),
                pltpu.make_async_copy(w1q_hbm, w1q_buf, dma_sems.at[1]),
                pltpu.make_async_copy(w2_hbm, w2_buf, dma_sems.at[2]))

    @pl.when(k == 0)
    def _():
        acc_ref[...] = jnp.zeros_like(acc_ref)
        # Kick off fusion / classification weight DMA so it overlaps the K loop.
        for cp in tail_copies():
            cp.start()
        # Question pooler: overlaps the image-weight streaming instead of
        # sitting in the serial epilogue of the last step.
        qpool_ref[...] = jnp.tanh(
            jnp.dot(qemb_ref[...].astype(jnp.bfloat16), wqe_ref[...],
                    preferred_element_type=jnp.float32) + bqe_ref[...])

    # Image pooler pre-activation accumulated over the K (img_dim) grid axis.
    # bf16 x bf16 on the MXU with f32 accumulation; the f32->bf16 cast of the
    # image tile is free VPU filler under the matmul.
    acc_ref[...] += jnp.dot(img_ref[...].astype(jnp.bfloat16), wie_ref[...],
                            preferred_element_type=jnp.float32)

    @pl.when(k == n_k - 1)
    def _():
        for cp in tail_copies():
            cp.wait()
        img_pool = jnp.tanh(acc_ref[...] + bie_ref[...])
        # torch.cat([img, q], 1) @ W1 == img @ W1[:h_img] + q @ W1[h_img:]
        fusion = (jnp.dot(img_pool.astype(jnp.bfloat16), w1i_buf[...],
                          preferred_element_type=jnp.float32)
                  + jnp.dot(qpool_ref[...].astype(jnp.bfloat16), w1q_buf[...],
                            preferred_element_type=jnp.float32)
                  + b1_ref[...])
        logits = (jnp.dot(fusion.astype(jnp.bfloat16), w2_buf[...],
                          preferred_element_type=jnp.float32) + b2_ref[...])
        out_ref[...] = logits.astype(out_ref.dtype)


# ------------------------------- glue / prep -------------------------------- #
def _prep_inputs(image, question, pp, plan):
    """Flatten image, embed + mean-pool question, zero-pad (all in f32)."""
    B = image.shape[0]
    img = image.reshape(B, -1).astype(jnp.float32)                  # [B, C*H*W]
    img = jnp.pad(img, ((0, plan.b_pad - B), (0, plan.k_pad - plan.img_dim)))
    qemb = pp["embed_table"][question].mean(axis=1)                  # [B, d_q]
    qemb = jnp.pad(qemb, ((0, plan.b_pad - B), (0, plan.dq_pad - plan.d_q)))
    return img, qemb


def prepare_params(params, plan):
    """One-time prep: split w1, pad to tiles, bf16 weights, pre-broadcast biases."""
    h_img = params["w_ie"].shape[1]

    def padw(x, r, c):
        return jnp.pad(x, ((0, r - x.shape[0]), (0, c - x.shape[1]))).astype(jnp.bfloat16)

    def padb(b, c):
        b = jnp.pad(b, ((0, 0), (0, c - b.shape[1]))).astype(jnp.float32)
        return jnp.asarray(jnp.broadcast_to(b, (plan.b_pad, c)))   # pre-broadcast

    w1_img, w1_q = params["w1"][:h_img, :], params["w1"][h_img:, :]
    return dict(
        w_ie=padw(params["w_ie"], plan.k_pad, plan.hi_pad),
        b_ie=padb(params["b_ie"], plan.hi_pad),
        w_qe=padw(params["w_qe"], plan.dq_pad, plan.hq_pad),
        b_qe=padb(params["b_qe"], plan.hq_pad),
        w1_img=padw(w1_img, plan.hi_pad, plan.i_pad),
        w1_q=padw(w1_q, plan.hq_pad, plan.i_pad),
        b1=padb(params["b1"], plan.i_pad),
        w2=padw(params["w2"], plan.i_pad, plan.na_pad),
        b2=padb(params["b2"], plan.na_pad),
        embed_table=params["embed_table"].astype(jnp.float32),
    )


def _vmem_limit_bytes(p):
    """Derive the scoped-VMEM limit from actual tile footprints (v7x-safe)."""
    blocks = (p.b_pad * p.tk * 4,            # image tile (f32)
              p.tk * p.hi_pad * 2,           # w_ie tile (bf16)
              p.b_pad * p.dq_pad * 4,        # q_emb
              p.dq_pad * p.hq_pad * 2,       # w_qe
              p.b_pad * p.hi_pad * 4, p.b_pad * p.hq_pad * 4,   # biases
              p.b_pad * p.i_pad * 4, p.b_pad * p.na_pad * 4,
              p.b_pad * p.na_pad * 4)        # output
    scratch = (p.b_pad * p.hi_pad * 4 + p.b_pad * p.hq_pad * 4
               + p.hi_pad * p.i_pad * 2 + p.hq_pad * p.i_pad * 2
               + p.i_pad * p.na_pad * 2)
    total = 2 * sum(blocks) + scratch        # double-buffered pipeline blocks
    return int(min(max(2 * total + (4 << 20), 16 << 20), 48 << 20))


# --------------------------------- forward ---------------------------------- #
@functools.partial(jax.jit, static_argnames=("plan",))
def vqa_forward(image, question, pp, *, plan):
    p = plan
    B = image.shape[0]
    assert B <= p.b_pad
    assert math.prod(image.shape[1:]) == p.img_dim
    assert p.k_pad % p.tk == 0
    k_tiles = p.k_pad // p.tk

    img, qemb = _prep_inputs(image, question, pp, p)

    operands = (img, pp["w_ie"], qemb, pp["w_qe"],
                pp["b_ie"], pp["b_qe"], pp["b1"], pp["b2"],
                pp["w1_img"], pp["w1_q"], pp["w2"])

    flops = 2 * p.b_pad * (p.k_pad * p.hi_pad + p.dq_pad * p.hq_pad
                           + (p.hi_pad + p.hq_pad) * p.i_pad
                           + p.i_pad * p.na_pad)
    bytes_accessed = (sum(int(x.size) * x.dtype.itemsize for x in operands)
                      + p.b_pad * p.na_pad * 4)

    grid_spec = pltpu.PrefetchScalarGridSpec(
        num_scalar_prefetch=0,
        grid=(k_tiles,),
        in_specs=[
            pl.BlockSpec((p.b_pad, p.tk), lambda k: (0, k)),       # image (K-tiled, f32)
            pl.BlockSpec((p.tk, p.hi_pad), lambda k: (k, 0)),      # w_ie (K-tiled, bf16)
            pl.BlockSpec((p.b_pad, p.dq_pad), lambda k: (0, 0)),   # q_emb (resident)
            pl.BlockSpec((p.dq_pad, p.hq_pad), lambda k: (0, 0)),  # w_qe (resident)
            pl.BlockSpec((p.b_pad, p.hi_pad), lambda k: (0, 0)),   # b_ie (pre-broadcast)
            pl.BlockSpec((p.b_pad, p.hq_pad), lambda k: (0, 0)),   # b_qe
            pl.BlockSpec((p.b_pad, p.i_pad), lambda k: (0, 0)),    # b1
            pl.BlockSpec((p.b_pad, p.na_pad), lambda k: (0, 0)),   # b2
            pl.BlockSpec(memory_space=pl.ANY),                     # w1_img (manual DMA)
            pl.BlockSpec(memory_space=pl.ANY),                     # w1_q   (manual DMA)
            pl.BlockSpec(memory_space=pl.ANY),                     # w2     (manual DMA)
        ],
        out_specs=pl.BlockSpec((p.b_pad, p.na_pad), lambda k: (0, 0)),
        scratch_shapes=[
            pltpu.VMEM((p.b_pad, p.hi_pad), jnp.float32),    # image-pooler accumulator
            pltpu.VMEM((p.b_pad, p.hq_pad), jnp.float32),    # question-pooler output
            pltpu.VMEM((p.hi_pad, p.i_pad), jnp.bfloat16),   # w1_img landing buffer
            pltpu.VMEM((p.hq_pad, p.i_pad), jnp.bfloat16),   # w1_q landing buffer
            pltpu.VMEM((p.i_pad, p.na_pad), jnp.bfloat16),   # w2 landing buffer
            pltpu.SemaphoreType.DMA((3,)),
        ],
    )

    out = pl.pallas_call(
        vqa_kernel,
        out_shape=jax.ShapeDtypeStruct((p.b_pad, p.na_pad), jnp.float32),
        grid_spec=grid_spec,
        compiler_params=pltpu.CompilerParams(
            dimension_semantics=("arbitrary",),
            vmem_limit_bytes=_vmem_limit_bytes(p)),
        cost_estimate=pl.CostEstimate(
            flops=flops,
            transcendentals=p.b_pad * (p.hi_pad + p.hq_pad),
            bytes_accessed=bytes_accessed),
    )(*operands)

    return out[:B, :p.n_answers]


# ----------------------------- references ----------------------------------- #
def reference_padded(image, question, pp, plan):
    """Same padded operands / bf16 casts as the kernel (validates kernel exactness)."""
    B = image.shape[0]
    img, qemb = _prep_inputs(image, question, pp, plan)
    img_pool = jnp.tanh(jnp.dot(img.astype(jnp.bfloat16), pp["w_ie"],
                                preferred_element_type=jnp.float32) + pp["b_ie"])
    q_pool = jnp.tanh(jnp.dot(qemb.astype(jnp.bfloat16), pp["w_qe"],
                              preferred_element_type=jnp.float32) + pp["b_qe"])
    fusion = (jnp.dot(img_pool.astype(jnp.bfloat16), pp["w1_img"],
                      preferred_element_type=jnp.float32)
              + jnp.dot(q_pool.astype(jnp.bfloat16), pp["w1_q"],
                        preferred_element_type=jnp.float32) + pp["b1"])
    logits = jnp.dot(fusion.astype(jnp.bfloat16), pp["w2"],
                     preferred_element_type=jnp.float32) + pp["b2"]
    return logits[:B, :plan.n_answers]


def reference_f32(image, question, params):
    """Unpadded all-f32 reference matching the PyTorch module semantics."""
    B = image.shape[0]
    img = image.reshape(B, -1).astype(jnp.float32)
    qemb = params["embed_table"][question].mean(axis=1)
    img_pool = jnp.tanh(img @ params["w_ie"] + params["b_ie"])
    q_pool = jnp.tanh(qemb @ params["w_qe"] + params["b_qe"])
    fused = jnp.concatenate([img_pool, q_pool], axis=1)
    fused = fused @ params["w1"] + params["b1"]
    return fused @ params["w2"] + params["b2"]


# ----------------------------- param construction --------------------------- #
def make_params(key, *, img_dim, h_img, vocab, d_q, h_q, inter, n_answers):
    ks = jax.random.split(key, 9)

    def linear(kw, kb, fan_in, fan_out):
        bound = 1.0 / math.sqrt(fan_in)
        w = jax.random.uniform(kw, (fan_in, fan_out), jnp.float32, -bound, bound)
        b = jax.random.uniform(kb, (1, fan_out), jnp.float32, -bound, bound)
        return w, b

    w_ie, b_ie = linear(ks[0], ks[1], img_dim, h_img)       # image pooler stand-in
    w_qe, b_qe = linear(ks[2], ks[3], d_q, h_q)             # question pooler stand-in
    w1, b1 = linear(ks[4], ks[5], h_img + h_q, inter)       # fusion_layer
    w2, b2 = linear(ks[6], ks[7], inter, n_answers)         # classification_layer
    embed_table = 0.02 * jax.random.normal(ks[8], (vocab, d_q), jnp.float32)
    return dict(w_ie=w_ie, b_ie=b_ie, w_qe=w_qe, b_qe=b_qe,
                w1=w1, b1=b1, w2=w2, b2=b2, embed_table=embed_table)


# ----------------------------------- main ------------------------------------ #
if __name__ == "__main__":
    # Small shapes consistent with the module's forward semantics.
    B, C, H, W = 2, 4, 16, 16          # image, NCHW
    S, VOCAB = 8, 50                   # question token ids
    H_IMG, H_Q, D_Q = 32, 32, 32       # encoder hidden sizes
    INTER = 64                         # intermediate_layer_size (scaled down)
    N_ANSWERS = 128                    # n_answers (scaled down)

    key = jax.random.PRNGKey(0)
    k_img, k_q, k_p = jax.random.split(key, 3)

    image = jax.random.normal(k_img, (B, C, H, W), jnp.float32)
    question = jax.random.randint(k_q, (B, S), 0, VOCAB, jnp.int32)

    params = make_params(k_p, img_dim=C * H * W, h_img=H_IMG, vocab=VOCAB,
                         d_q=D_Q, h_q=H_Q, inter=INTER, n_answers=N_ANSWERS)
    # TODO(synk): the real image_encoder / question_encoder are external
    # pretrained HuggingFace transformers; they are replaced by deterministic
    # flatten/embed + Linear + tanh pooler stand-ins.
    plan = make_plan(batch=B, img_dim=C * H * W, h_img=H_IMG, d_q=D_Q,
                     h_q=H_Q, inter=INTER, n_answers=N_ANSWERS)
    pp = prepare_params(params, plan)

    logits = vqa_forward(image, question, pp, plan=plan)
    jax.block_until_ready(logits)

    assert logits.shape == (B, N_ANSWERS) and logits.dtype == jnp.float32
    assert bool(jnp.all(jnp.isfinite(logits)))

    ref_pad = reference_padded(image, question, pp, plan)
    ref_f32 = reference_f32(image, question, params)
    assert bool(jnp.allclose(logits, ref_pad, atol=2e-2, rtol=2e-2)), \
        "mismatch vs identically-quantized reference"
    assert bool(jnp.allclose(logits, ref_f32, atol=5e-2, rtol=5e-2)), \
        "mismatch vs full-f32 reference"
    print("KERNEL_OK")
</pallas_src>

<mosaic_0001>
module attributes {stable_mosaic.version = 11 : i64} {
  func.func @vqa_kernel(%arg0: i32, %arg1: memref<16x1024xf32, #tpu.memory_space<vmem>>, %arg2: memref<1024x128xbf16, #tpu.memory_space<vmem>>, %arg3: memref<16x128xf32, #tpu.memory_space<vmem>>, %arg4: memref<128x128xbf16, #tpu.memory_space<vmem>>, %arg5: memref<16x128xf32, #tpu.memory_space<vmem>>, %arg6: memref<16x128xf32, #tpu.memory_space<vmem>>, %arg7: memref<16x128xf32, #tpu.memory_space<vmem>>, %arg8: memref<16x128xf32, #tpu.memory_space<vmem>>, %arg9: memref<128x128xbf16, #tpu.memory_space<any>>, %arg10: memref<128x128xbf16, #tpu.memory_space<any>>, %arg11: memref<128x128xbf16, #tpu.memory_space<any>>, %arg12: memref<16x128xf32, #tpu.memory_space<vmem>>, %arg13: memref<16x128xf32, #tpu.memory_space<vmem>>, %arg14: memref<16x128xf32, #tpu.memory_space<vmem>>, %arg15: memref<128x128xbf16, #tpu.memory_space<vmem>>, %arg16: memref<128x128xbf16, #tpu.memory_space<vmem>>, %arg17: memref<128x128xbf16, #tpu.memory_space<vmem>>, %arg18: memref<3x!tpu.dma_semaphore, #tpu.memory_space<semaphore_mem>>) attributes {dimension_semantics = [#tpu.dimension_semantics<arbitrary>], iteration_bounds = array<i64: 1>, scalar_prefetch = 0 : i64, scratch_operands = 6 : i64, tpu.core_type = #tpu.core_type<tc>, window_params = [{transform_indices = @transform_0, window_bounds = array<i64: 16, 1024>}, {transform_indices = @transform_1, window_bounds = array<i64: 1024, 128>}, {pipeline_mode = #tpu.pipeline_mode<synchronous>, transform_indices = @transform_2, window_bounds = array<i64: 16, 128>}, {pipeline_mode = #tpu.pipeline_mode<synchronous>, transform_indices = @transform_3, window_bounds = array<i64: 128, 128>}, {pipeline_mode = #tpu.pipeline_mode<synchronous>, transform_indices = @transform_4, window_bounds = array<i64: 16, 128>}, {pipeline_mode = #tpu.pipeline_mode<synchronous>, transform_indices = @transform_5, window_bounds = array<i64: 16, 128>}, {pipeline_mode = #tpu.pipeline_mode<synchronous>, transform_indices = @transform_6, window_bounds = array<i64: 16, 128>}, {pipeline_mode = #tpu.pipeline_mode<synchronous>, transform_indices = @transform_7, window_bounds = array<i64: 16, 128>}, {}, {}, {}, {pipeline_mode = #tpu.pipeline_mode<synchronous>, transform_indices = @transform_11, window_bounds = array<i64: 16, 128>}]} {
    %c0_i32 = arith.constant 0 : i32
    %0 = arith.cmpi eq, %arg0, %c0_i32 : i32
    %1 = arith.extui %0 : i1 to i32
    %c0_i32_0 = arith.constant 0 : i32
    %2 = arith.cmpi ne, %1, %c0_i32_0 : i32
    scf.if %2 {
      %cst_10 = arith.constant 0.000000e+00 : f32
      %13 = vector.broadcast %cst_10 : f32 to vector<16x128xf32>
      %c0_11 = arith.constant 0 : index
      %c0_12 = arith.constant 0 : index
      %14 = vector.load %arg13[%c0_11, %c0_12] : memref<16x128xf32, #tpu.memory_space<vmem>>, vector<16x128xf32>
      tpu.vector_store %arg13[%c0_11, %c0_12], %13 {strides = array<i32>} : memref<16x128xf32, #tpu.memory_space<vmem>>, vector<16x128xf32>,
      %c0_i32_13 = arith.constant 0 : i32
      %15 = tpu.memref_slice %arg18[%c0_i32_13] : memref<3x!tpu.dma_semaphore, #tpu.memory_space<semaphore_mem>> -> memref<1x!tpu.dma_semaphore, #tpu.memory_space<semaphore_mem>>
      %16 = tpu.memref_squeeze %15 : memref<1x!tpu.dma_semaphore, #tpu.memory_space<semaphore_mem>> -> memref<!tpu.dma_semaphore, #tpu.memory_space<semaphore_mem>>
      tpu.enqueue_dma source(%arg9 : memref<128x128xbf16, #tpu.memory_space<any>>) target(%arg15 : memref<128x128xbf16, #tpu.memory_space<vmem>>) target_semaphore(%16 : memref<!tpu.dma_semaphore, #tpu.memory_space<semaphore_mem>>)
      %c1_i32 = arith.constant 1 : i32
      %17 = tpu.memref_slice %arg18[%c1_i32] : memref<3x!tpu.dma_semaphore, #tpu.memory_space<semaphore_mem>> -> memref<1x!tpu.dma_semaphore, #tpu.memory_space<semaphore_mem>>
      %18 = tpu.memref_squeeze %17 : memref<1x!tpu.dma_semaphore, #tpu.memory_space<semaphore_mem>> -> memref<!tpu.dma_semaphore, #tpu.memory_space<semaphore_mem>>
      tpu.enqueue_dma source(%arg10 : memref<128x128xbf16, #tpu.memory_space<any>>) target(%arg16 : memref<128x128xbf16, #tpu.memory_space<vmem>>) target_semaphore(%18 : memref<!tpu.dma_semaphore, #tpu.memory_space<semaphore_mem>>)
      %c2_i32 = arith.constant 2 : i32
      %19 = tpu.memref_slice %arg18[%c2_i32] : memref<3x!tpu.dma_semaphore, #tpu.memory_space<semaphore_mem>> -> memref<1x!tpu.dma_semaphore, #tpu.memory_space<semaphore_mem>>
      %20 = tpu.memref_squeeze %19 : memref<1x!tpu.dma_semaphore, #tpu.memory_space<semaphore_mem>> -> memref<!tpu.dma_semaphore, #tpu.memory_space<semaphore_mem>>
      tpu.enqueue_dma source(%arg11 : memref<128x128xbf16, #tpu.memory_space<any>>) target(%arg17 : memref<128x128xbf16, #tpu.memory_space<vmem>>) target_semaphore(%20 : memref<!tpu.dma_semaphore, #tpu.memory_space<semaphore_mem>>)
      %c0_14 = arith.constant 0 : index
      %c0_15 = arith.constant 0 : index
      %21 = vector.load %arg3[%c0_14, %c0_15] : memref<16x128xf32, #tpu.memory_space<vmem>>, vector<16x128xf32>
      %22 = arith.truncf %21 : vector<16x128xf32> to vector<16x128xbf16>
      %c0_16 = arith.constant 0 : index
      %c0_17 = arith.constant 0 : index
      %23 = vector.load %arg4[%c0_16, %c0_17] : memref<128x128xbf16, #tpu.memory_space<vmem>>, vector<128x128xbf16>
      %cst_18 = arith.constant dense<0.000000e+00> : vector<16x128xf32>
      %24 = tpu.matmul %22, %23, %cst_18 {dimension_numbers = #tpu.dot_dimension_numbers<[1], [0], [0], [1], [0, 0, 1, 1], [], []>} : vector<16x128xbf16>, vector<128x128xbf16>, vector<16x128xf32> -> vector<16x128xf32>
      %c0_19 = arith.constant 0 : index
      %c0_20 = arith.constant 0 : index
      %25 = vector.load %arg6[%c0_19, %c0_20] : memref<16x128xf32, #tpu.memory_space<vmem>>, vector<16x128xf32>
      %26 = arith.addf %24, %25 : vector<16x128xf32>
      %27 = math.tanh %26 : vector<16x128xf32>
      %c0_21 = arith.constant 0 : index
      %c0_22 = arith.constant 0 : index
      %28 = vector.load %arg14[%c0_21, %c0_22] : memref<16x128xf32, #tpu.memory_space<vmem>>, vector<16x128xf32>
      tpu.vector_store %arg14[%c0_21, %c0_22], %27 {strides = array<i32>} : memref<16x128xf32, #tpu.memory_space<vmem>>, vector<16x128xf32>,
    } else {
    }
    %c0 = arith.constant 0 : index
    %c0_1 = arith.constant 0 : index
    %3 = vector.load %arg13[%c0, %c0_1] : memref<16x128xf32, #tpu.memory_space<vmem>>, vector<16x128xf32>
    %c0_2 = arith.constant 0 : index
    %c0_3 = arith.constant 0 : index
    %4 = vector.load %arg1[%c0_2, %c0_3] : memref<16x1024xf32, #tpu.memory_space<vmem>>, vector<16x1024xf32>
    %5 = arith.truncf %4 : vector<16x1024xf32> to vector<16x1024xbf16>
    %c0_4 = arith.constant 0 : index
    %c0_5 = arith.constant 0 : index
    %6 = vector.load %arg2[%c0_4, %c0_5] : memref<1024x128xbf16, #tpu.memory_space<vmem>>, vector<1024x128xbf16>
    %cst = arith.constant dense<0.000000e+00> : vector<16x128xf32>
    %7 = tpu.matmul %5, %6, %cst {dimension_numbers = #tpu.dot_dimension_numbers<[1], [0], [0], [1], [0, 0, 1, 1], [], []>} : vector<16x1024xbf16>, vector<1024x128xbf16>, vector<16x128xf32> -> vector<16x128xf32>
    %8 = arith.addf %3, %7 : vector<16x128xf32>
    %c0_6 = arith.constant 0 : index
    %c0_7 = arith.constant 0 : index
    %9 = vector.load %arg13[%c0_6, %c0_7] : memref<16x128xf32, #tpu.memory_space<vmem>>, vector<16x128xf32>
    tpu.vector_store %arg13[%c0_6, %c0_7], %8 {strides = array<i32>} : memref<16x128xf32, #tpu.memory_space<vmem>>, vector<16x128xf32>,
    %c0_i32_8 = arith.constant 0 : i32
    %10 = arith.cmpi eq, %arg0, %c0_i32_8 : i32
    %11 = arith.extui %10 : i1 to i32
    %c0_i32_9 = arith.constant 0 : i32
    %12 = arith.cmpi ne, %11, %c0_i32_9 : i32
    scf.if %12 {
      %c0_i32_10 = arith.constant 0 : i32
      %13 = tpu.memref_slice %arg18[%c0_i32_10] : memref<3x!tpu.dma_semaphore, #tpu.memory_space<semaphore_mem>> -> memref<1x!tpu.dma_semaphore, #tpu.memory_space<semaphore_mem>>
      %14 = tpu.memref_squeeze %13 : memref<1x!tpu.dma_semaphore, #tpu.memory_space<semaphore_mem>> -> memref<!tpu.dma_semaphore, #tpu.memory_space<semaphore_mem>>
      tpu.wait_dma2 semaphore(%14 : memref<!tpu.dma_semaphore, #tpu.memory_space<semaphore_mem>>) src(%arg9 : memref<128x128xbf16, #tpu.memory_space<any>>) dst(%arg15 : memref<128x128xbf16, #tpu.memory_space<vmem>>)
      %c1_i32 = arith.constant 1 : i32
      %15 = tpu.memref_slice %arg18[%c1_i32] : memref<3x!tpu.dma_semaphore, #tpu.memory_space<semaphore_mem>> -> memref<1x!tpu.dma_semaphore, #tpu.memory_space<semaphore_mem>>
      %16 = tpu.memref_squeeze %15 : memref<1x!tpu.dma_semaphore, #tpu.memory_space<semaphore_mem>> -> memref<!tpu.dma_semaphore, #tpu.memory_space<semaphore_mem>>
      tpu.wait_dma2 semaphore(%16 : memref<!tpu.dma_semaphore, #tpu.memory_space<semaphore_mem>>) src(%arg10 : memref<128x128xbf16, #tpu.memory_space<any>>) dst(%arg16 : memref<128x128xbf16, #tpu.memory_space<vmem>>)
      %c2_i32 = arith.constant 2 : i32
      %17 = tpu.memref_slice %arg18[%c2_i32] : memref<3x!tpu.dma_semaphore, #tpu.memory_space<semaphore_mem>> -> memref<1x!tpu.dma_semaphore, #tpu.memory_space<semaphore_mem>>
      %18 = tpu.memref_squeeze %17 : memref<1x!tpu.dma_semaphore, #tpu.memory_space<semaphore_mem>> -> memref<!tpu.dma_semaphore, #tpu.memory_space<semaphore_mem>>
      tpu.wait_dma2 semaphore(%18 : memref<!tpu.dma_semaphore, #tpu.memory_space<semaphore_mem>>) src(%arg11 : memref<128x128xbf16, #tpu.memory_space<any>>) dst(%arg17 : memref<128x128xbf16, #tpu.memory_space<vmem>>)
      %c0_11 = arith.constant 0 : index
      %c0_12 = arith.constant 0 : index
      %19 = vector.load %arg13[%c0_11, %c0_12] : memref<16x128xf32, #tpu.memory_space<vmem>>, vector<16x128xf32>
      %c0_13 = arith.constant 0 : index
      %c0_14 = arith.constant 0 : index
      %20 = vector.load %arg5[%c0_13, %c0_14] : memref<16x128xf32, #tpu.memory_space<vmem>>, vector<16x128xf32>
      %21 = arith.addf %19, %20 : vector<16x128xf32>
      %22 = math.tanh %21 : vector<16x128xf32>
      %23 = arith.truncf %22 : vector<16x128xf32> to vector<16x128xbf16>
      %c0_15 = arith.constant 0 : index
      %c0_16 = arith.constant 0 : index
      %24 = vector.load %arg15[%c0_15, %c0_16] : memref<128x128xbf16, #tpu.memory_space<vmem>>, vector<128x128xbf16>
      %cst_17 = arith.constant dense<0.000000e+00> : vector<16x128xf32>
      %25 = tpu.matmul %23, %24, %cst_17 {dimension_numbers = #tpu.dot_dimension_numbers<[1], [0], [0], [1], [0, 0, 1, 1], [], []>} : vector<16x128xbf16>, vector<128x128xbf16>, vector<16x128xf32> -> vector<16x128xf32>
      %c0_18 = arith.constant 0 : index
      %c0_19 = arith.constant 0 : index
      %26 = vector.load %arg14[%c0_18, %c0_19] : memref<16x128xf32, #tpu.memory_space<vmem>>, vector<16x128xf32>
      %27 = arith.truncf %26 : vector<16x128xf32> to vector<16x128xbf16>
      %c0_20 = arith.constant 0 : index
      %c0_21 = arith.constant 0 : index
      %28 = vector.load %arg16[%c0_20, %c0_21] : memref<128x128xbf16, #tpu.memory_space<vmem>>, vector<128x128xbf16>
      %cst_22 = arith.constant dense<0.000000e+00> : vector<16x128xf32>
      %29 = tpu.matmul %27, %28, %cst_22 {dimension_numbers = #tpu.dot_dimension_numbers<[1], [0], [0], [1], [0, 0, 1, 1], [], []>} : vector<16x128xbf16>, vector<128x128xbf16>, vector<16x128xf32> -> vector<16x128xf32>
      %30 = arith.addf %25, %29 : vector<16x128xf32>
      %c0_23 = arith.constant 0 : index
      %c0_24 = arith.constant 0 : index
      %31 = vector.load %arg7[%c0_23, %c0_24] : memref<16x128xf32, #tpu.memory_space<vmem>>, vector<16x128xf32>
      %32 = arith.addf %30, %31 : vector<16x128xf32>
      %33 = arith.truncf %32 : vector<16x128xf32> to vector<16x128xbf16>
      %c0_25 = arith.constant 0 : index
      %c0_26 = arith.constant 0 : index
      %34 = vector.load %arg17[%c0_25, %c0_26] : memref<128x128xbf16, #tpu.memory_space<vmem>>, vector<128x128xbf16>
      %cst_27 = arith.constant dense<0.000000e+00> : vector<16x128xf32>
      %35 = tpu.matmul %33, %34, %cst_27 {dimension_numbers = #tpu.dot_dimension_numbers<[1], [0], [0], [1], [0, 0, 1, 1], [], []>} : vector<16x128xbf16>, vector<128x128xbf16>, vector<16x128xf32> -> vector<16x128xf32>
      %c0_28 = arith.constant 0 : index
      %c0_29 = arith.constant 0 : index
      %36 = vector.load %arg8[%c0_28, %c0_29] : memref<16x128xf32, #tpu.memory_space<vmem>>, vector<16x128xf32>
      %37 = arith.addf %35, %36 : vector<16x128xf32>
      %c0_30 = arith.constant 0 : index
      %c0_31 = arith.constant 0 : index
      %38 = vector.load %arg12[%c0_30, %c0_31] : memref<16x128xf32, #tpu.memory_space<vmem>>, vector<16x128xf32>
      tpu.vector_store %arg12[%c0_30, %c0_31], %37 {strides = array<i32>} : memref<16x128xf32, #tpu.memory_space<vmem>>, vector<16x128xf32>,
    } else {
    }
    return
  }
  func.func @transform_0(%arg0: i32) -> (i32, i32) {
    %c0_i32 = arith.constant 0 : i32
    %c0_i32_0 = arith.constant 0 : i32
    return %c0_i32, %arg0 : i32, i32
  }
  func.func @transform_1(%arg0: i32) -> (i32, i32) {
    %c0_i32 = arith.constant 0 : i32
    %c0_i32_0 = arith.constant 0 : i32
    return %arg0, %c0_i32 : i32, i32
  }
  func.func @transform_2(%arg0: i32) -> (i32, i32) {
    %c0_i32 = arith.constant 0 : i32
    %c0_i32_0 = arith.constant 0 : i32
    %c0_i32_1 = arith.constant 0 : i32
    return %c0_i32, %c0_i32_0 : i32, i32
  }
  func.func @transform_3(%arg0: i32) -> (i32, i32) {
    %c0_i32 = arith.constant 0 : i32
    %c0_i32_0 = arith.constant 0 : i32
    %c0_i32_1 = arith.constant 0 : i32
    return %c0_i32, %c0_i32_0 : i32, i32
  }
  func.func @transform_4(%arg0: i32) -> (i32, i32) {
    %c0_i32 = arith.constant 0 : i32
    %c0_i32_0 = arith.constant 0 : i32
    %c0_i32_1 = arith.constant 0 : i32
    return %c0_i32, %c0_i32_0 : i32, i32
  }
  func.func @transform_5(%arg0: i32) -> (i32, i32) {
    %c0_i32 = arith.constant 0 : i32
    %c0_i32_0 = arith.constant 0 : i32
    %c0_i32_1 = arith.constant 0 : i32
    return %c0_i32, %c0_i32_0 : i32, i32
  }
  func.func @transform_6(%arg0: i32) -> (i32, i32) {
    %c0_i32 = arith.constant 0 : i32
    %c0_i32_0 = arith.constant 0 : i32
    %c0_i32_1 = arith.constant 0 : i32
    return %c0_i32, %c0_i32_0 : i32, i32
  }
  func.func @transform_7(%arg0: i32) -> (i32, i32) {
    %c0_i32 = arith.constant 0 : i32
    %c0_i32_0 = arith.constant 0 : i32
    %c0_i32_1 = arith.constant 0 : i32
    return %c0_i32, %c0_i32_0 : i32, i32
  }
  func.func @transform_11(%arg0: i32) -> (i32, i32) {
    %c0_i32 = arith.constant 0 : i32
    %c0_i32_0 = arith.constant 0 : i32
    %c0_i32_1 = arith.constant 0 : i32
    return %c0_i32, %c0_i32_0 : i32, i32
  }
}

</mosaic_0001>

<bundles_post_ra>
// kernel: vqa_forward.1
= control target key start
LH: loop header
LB: loop body
LE: loop exit
PB: predicated region body
PF: predicated region fallthrough
CT: control target
= control target key end

     0   :  { %16 = vsyncpa [#allocation9], 0  ;;  %s2273_s0 = inlined_call_operand.vmem [shape: f32[16,1024], index: 0, kind: input, shape index: {}]   ;;  %s2274_s1 = inlined_call_operand.vmem [shape: bf16[1024,128], index: 1, kind: input, shape index: {}]   ;;  %s2275_s2 = inlined_call_operand.vmem [shape: f32[16,128], index: 2, kind: input, shape index: {}]   ;;  %s2276_s3 = inlined_call_operand.vmem [shape: bf16[128,128], index: 3, kind: input, shape index: {}]   ;;  %s2277_s4 = inlined_call_operand.vmem [shape: f32[16,128], index: 4, kind: input, shape index: {}]   ;;  %s2278_s5 = inlined_call_operand.hbm [shape: f32[16,128], index: 5, kind: input, shape index: {}]   ;;  %s2279_s6 = inlined_call_operand.hbm [shape: f32[16,128], index: 6, kind: input, shape index: {}]   ;;  %s2280_s7 = inlined_call_operand.hbm [shape: f32[16,128], index: 7, kind: input, shape index: {}]   ;;  %s2281_s8 = inlined_call_operand.hbm [shape: bf16[128,128], index: 8, kind: input, shape index: {}]   ;;  %s2282_s9 = inlined_call_operand.hbm [shape: bf16[128,128], index: 9, kind: input, shape index: {}]   ;;  %s2283_s10 = inlined_call_operand.hbm [shape: bf16[128,128], index: 10, kind: input, shape index: {}]   ;;  %s2284_s11 = inlined_call_operand.vmem [shape: f32[16,128], index: 11, kind: output, shape index: {}]  }
   0x1   :  { %17 = vsyncpa [#allocation11], 0  ;;  %s1857_s17 = smov [#allocation10]   ;;  %s1858_s19 = smov [#allocation8]  }
   0x2   :  { %s45_s18 = sshll.u32 %s1857_s17, 4  ;;  %s33_s20 = sshll.u32 %s1858_s19, 4  ;;  %s46_s18 = int_to_ptr.vmem [resolvable:$true] %s45_s18  ;;  %s34_s20 = int_to_ptr.vmem [resolvable:$true] %s33_s20 }
   0x3   :  { %s1735_s21 = scalar_lea.vmem %s46_s18, 256  ;;  %p1740_p1 = scmp.lt.s32.totalorder %s46_s18, %s46_s18 }
   0x4   :  { %p1736_p0 = scmp.ne.s32.totalorder %s46_s18, %s1735_s21  ;;  %p1741_p2 = scmp.lt.s32.totalorder %s1735_s21, %s1735_s21 }
   0x6   :  { %p1742_p3 = por %p1741_p2, %p1740_p1 }
   0x8   :  { %p1743_p4 = pnand %p1742_p3, %p1736_p0 }
   0xa   :  { %1746 = shalt.err (!%p1743_p4)
}
   0xb   :  { %s1859_s22 = smov 128   ;;  %s1860_s23 = smov 8  }
   0xc   :  { %51 = dma.hbm_to_vmem [thread:$0]  %s2279_s6, 256, %s46_s18, [#allocation11], %s1859_s22, %s1859_s22, %s1860_s23  }
   0xd   :  { %s1755_s26 = scalar_lea.vmem %s34_s20, 256  ;;  %p1760_p6 = scmp.lt.s32.totalorder %s34_s20, %s34_s20 }
   0xe   :  { %p1756_p5 = scmp.ne.s32.totalorder %s34_s20, %s1755_s26  ;;  %p1761_p7 = scmp.lt.s32.totalorder %s1755_s26, %s1755_s26 }
  0x10   :  { %p1762_p8 = por %p1761_p7, %p1760_p6 }
  0x12   :  { %p1763_p9 = pnand %p1762_p8, %p1756_p5 }
  0x14   :  { %1766 = shalt.err (!%p1763_p9)
}
  0x15   :  { %39 = dma.hbm_to_vmem [thread:$0]  %s2278_s5, 256, %s34_s20, [#allocation9], %s1859_s22, %s1859_s22, %s1860_s23  }
  0x16   :  { %s1861_s29 = smov [#allocation12]  }
  0x17   :  { %s57_s30 = sshll.u32 %s1861_s29, 4  ;;  %s58_s30 = int_to_ptr.vmem [resolvable:$true] %s57_s30 }
  0x18   :  { %s1775_s12 = scalar_lea.vmem %s58_s30, 256  ;;  %p1780_p11 = scmp.lt.s32.totalorder %s58_s30, %s58_s30 }
  0x19   :  { %p1776_p10 = scmp.ne.s32.totalorder %s58_s30, %s1775_s12  ;;  %p1781_p12 = scmp.lt.s32.totalorder %s1775_s12, %s1775_s12 }
  0x1b   :  { %p1782_p13 = por %p1781_p12, %p1780_p11 }
  0x1d   :  { %p1783_p0 = pnand %p1782_p13, %p1776_p10 }
  0x1f   :  { %1786 = shalt.err (!%p1783_p0)
}
  0x20   :  { %63 = dma.hbm_to_vmem [thread:$0]  %s2280_s7, 256, %s58_s30, [#allocation11], %s1859_s22, %s1859_s22, %s1860_s23  }
  0x21   :  { %1847 = dma.done.wait [#allocation9], 256  }
  0x22   :  { %1848 = vsyncadd [#allocation9], 4294967040 }
  0x23   :  { %1849 = dma.done.wait [#allocation11], 512  }
  0x24   :  { %1850 = vsyncadd [#allocation11], 4294966784  ;;  %v1862_v0 = vmov 0.0   ;;  %vm1863_vm0 = vmmov 0   ;;  %v1623_v1 = vld [vmem:[%s2276_s3 + $0x38] sm:$0xff]   ;;  %v1626_v4 = vld [vmem:[%s2276_s3 + $0x30] sm:$0xff]  }
  0x25   :  { %1533 = vmatprep.subr.bf16.mxu0 %v1862_v0  ;;  %1549 = vmatprep.mubr.msk.bf16.mxu0 %vm1863_vm0, %v1862_v0  ;;  %v1624_v2 = vld [vmem:[%s2274_s1 + $0x78] sm:$0xff]   ;;  %v1627_v5 = vld [vmem:[%s2274_s1 + $0x70] sm:$0xff]   ;;  %v1629_v7 = vld [vmem:[%s2276_s3 + $0x28] sm:$0xff]   ;;  %s1864_s26 = smov [#allocation4]   ;;  %s1865_s28 = smov [#allocation5]  }
  0x26   :  { %1534 = vmatpush3.bf16.msra.mxu0 %v1623_v1  ;;  %v1625_v3 = vld [vmem:[%s2274_s1 + $0x38] sm:$0xff]   ;;  %1418 = vmatprep.subr.bf16.mxu1 %v1624_v2  ;;  %v1628_v6 = vld [vmem:[%s2274_s1 + $0x30] sm:$0xff]   ;;  %v1630_v8 = vld [vmem:[%s2274_s1 + $0x68] sm:$0xff]   ;;  %s87_s27 = sshll.u32 %s1864_s26, 4  ;;  %s99_s29 = sshll.u32 %s1865_s28, 4  ;;  %s88_s27 = int_to_ptr.vmem [resolvable:$true] %s87_s27  ;;  %s100_s29 = int_to_ptr.vmem [resolvable:$true] %s99_s29 }
  0x27   :  { %1535 = vmatprep.subr.bf16.mxu0 %v1862_v0  ;;  %1419 = vmatpush3.bf16.msra.mxu1 %v1625_v3  ;;  %v1631_v9 = vld [vmem:[%s2274_s1 + $0x28] sm:$0xff]   ;;  %v1632_v10 = vld [vmem:[%s2276_s3 + $0x20] sm:$0xff]   ;;  %v1636_v13 = vld [vmem:[%s2274_s1 + $0x58] sm:$0xff]   ;;  %s1795_s30 = scalar_lea.vmem %s88_s27, 1024  ;;  %p1800_p2 = scmp.lt.s32.totalorder %s88_s27, %s88_s27 }
  0x28   :  { %1420 = vmatprep.subr.bf16.mxu1 %v1627_v5  ;;  %v1633_v11 = vld [vmem:[%s2274_s1 + $0x60] sm:$0xff]   ;;  %v1635_v14 = vld [vmem:[%s2276_s3 + $0x18] sm:$0xff]   ;;  %v1639_v16 = vld [vmem:[%s2274_s1 + $0x50] sm:$0xff]   ;;  %p1796_p1 = scmp.ne.s32.totalorder %s88_s27, %s1795_s30  ;;  %p1801_p3 = scmp.lt.s32.totalorder %s1795_s30, %s1795_s30 }
  0x29   :  { %v1634_v12 = vld [vmem:[%s2274_s1 + $0x20] sm:$0xff]   ;;  %v1637_v15 = vld [vmem:[%s2274_s1 + $0x18] sm:$0xff]   ;;  %v1638_v17 = vld [vmem:[%s2276_s3 + $0x10] sm:$0xff]  }
  0x2a   :  { %1536 = vmatpush3.bf16.msra.mxu0 %v1626_v4  ;;  %v1640_v18 = vld [vmem:[%s2274_s1 + $0x10] sm:$0xff]   ;;  %v1642_v19 = vld [vmem:[%s2274_s1 + $0x48] sm:$0xff]   ;;  %v1644_v22 = vld [vmem:[%s2276_s3] sm:$0xff]   ;;  %p1802_p4 = por %p1801_p3, %p1800_p2 }
  0x2b   :  { %1537 = vmatprep.subr.bf16.mxu0 %v1862_v0  ;;  %1421 = vmatpush3.bf16.msra.mxu1 %v1628_v6  ;;  %v1641_v20 = vld [vmem:[%s2276_s3 + $0x8] sm:$0xff]   ;;  %v1645_v23 = vld [vmem:[%s2274_s1 + $0x40] sm:$0xff]   ;;  %v1647_v27 = vld [vmem:[%s2274_s1 + $0xf8] sm:$0xff]  }
  0x2c   :  { %1422 = vmatprep.subr.bf16.mxu1 %v1630_v8  ;;  %v1643_v21 = vld [vmem:[%s2274_s1 + $0x8] sm:$0xff]   ;;  %v115_v24 = vld [vmem:[%s2275_s2] sm:$0xff]  ;;  %v1648_v30 = vld [vmem:[%s2274_s1 + $0xb8] sm:$0xff]   ;;  %p1803_p5 = pnand %p1802_p4, %p1796_p1 }
  0x2d   :  { %v116_v25 = vld [vmem:[%s2275_s2 + $0x8] sm:$0xff]  ;;  %v1646_v26 = vld [vmem:[%s2274_s1] sm:$0xff]   ;;  %v1649_v35 = vld [vmem:[%s2274_s1 + $0x178] sm:$0xff]  }
  0x2e   :  { %1538 = vmatpush3.bf16.msra.mxu0 %v1629_v7  ;;  %v232_v28 = vld [vmem:[%s2273_s0 + $0x8] sm:$0xff]  ;;  %v231_v32 = vld [vmem:[%s2273_s0] sm:$0xff]  ;;  %v117_v34 = vpack.c.bf16 %v116_v25, %v115_v24  ;;  %v1650_v36 = vld [vmem:[%s2274_s1 + $0x138] sm:$0xff]  }
  0x2f   :  { %1539 = vmatprep.subr.bf16.mxu0 %v1862_v0  ;;  %1423 = vmatpush3.bf16.msra.mxu1 %v1631_v9  ;;  %v240_v29 = vld [vmem:[%s2273_s0 + $0x48] sm:$0xff]  ;;  %v239_v33 = vld [vmem:[%s2273_s0 + $0x40] sm:$0xff]  ;;  %v1651_v38 = vld [vmem:[%s2274_s1 + $0xf0] sm:$0xff]  }
  0x30   :  { %1424 = vmatprep.subr.bf16.mxu1 %v1633_v11  ;;  %v248_v31 = vpack.c.bf16 %v240_v29, %v232_v28  ;;  %v247_v37 = vpack.c.bf16 %v239_v33, %v231_v32  ;;  %v1652_v39 = vld [vmem:[%s2274_s1 + $0xb0] sm:$0xff]   ;;  %v1655_v42 = vld [vmem:[%s2274_s1 + $0xe8] sm:$0xff]   ;;  %v1659_v46 = vld [vmem:[%s2274_s1 + $0xe0] sm:$0xff]  }
  0x31   :  { %v1653_v40 = vld [vmem:[%s2274_s1 + $0x170] sm:$0xff]   ;;  %v1656_v43 = vld [vmem:[%s2274_s1 + $0xa8] sm:$0xff]   ;;  %v1660_v47 = vld [vmem:[%s2274_s1 + $0xa0] sm:$0xff]  }
  0x32   :  { %1540 = vmatpush3.bf16.msra.mxu0 %v1632_v10  ;;  %799 = vmatprep.mubr.bf16.mxu1 %v248_v31  ;;  %v1654_v41 = vld [vmem:[%s2274_s1 + $0x130] sm:$0xff]   ;;  %v1657_v44 = vld [vmem:[%s2274_s1 + $0x168] sm:$0xff]   ;;  %v1661_v48 = vld [vmem:[%s2274_s1 + $0x160] sm:$0xff]  }
  0x33   :  { %1541 = vmatprep.subr.bf16.mxu0 %v1862_v0  ;;  %1425 = vmatpush3.bf16.msra.mxu1 %v1634_v12  ;;  %v1658_v45 = vld [vmem:[%s2274_s1 + $0x128] sm:$0xff]   ;;  %v1662_v49 = vld [vmem:[%s2274_s1 + $0x120] sm:$0xff]   ;;  %v1663_v50 = vld [vmem:[%s2274_s1 + $0xd8] sm:$0xff]  }
  0x34   :  { %1426 = vmatprep.subr.bf16.mxu1 %v1636_v13  ;;  %v1664_v51 = vld [vmem:[%s2274_s1 + $0x98] sm:$0xff]   ;;  %v1667_v54 = vld [vmem:[%s2274_s1 + $0xd0] sm:$0xff]   ;;  %v1671_v58 = vld [vmem:[%s2274_s1 + $0xc8] sm:$0xff]  }
  0x35   :  { %v1665_v52 = vld [vmem:[%s2274_s1 + $0x158] sm:$0xff]   ;;  %v1668_v55 = vld [vmem:[%s2274_s1 + $0x90] sm:$0xff]   ;;  %v1672_v59 = vld [vmem:[%s2274_s1 + $0x88] sm:$0xff]  }
  0x36   :  { %1542 = vmatpush3.bf16.msra.mxu0 %v1635_v14  ;;  %v1666_v53 = vld [vmem:[%s2274_s1 + $0x118] sm:$0xff]   ;;  %v1669_v56 = vld [vmem:[%s2274_s1 + $0x150] sm:$0xff]   ;;  %v1673_v60 = vld [vmem:[%s2274_s1 + $0x148] sm:$0xff]  }
  0x37   :  { %1543 = vmatprep.subr.bf16.mxu0 %v1862_v0  ;;  %1427 = vmatpush3.bf16.msra.mxu1 %v1637_v15  ;;  %v1670_v57 = vld [vmem:[%s2274_s1 + $0x110] sm:$0xff]   ;;  %v1674_v61 = vld [vmem:[%s2274_s1 + $0x108] sm:$0xff]   ;;  %v1675_v62 = vld [vmem:[%s2274_s1 + $0xc0] sm:$0xff]  }
  0x38   :  { %1428 = vmatprep.subr.bf16.mxu1 %v1639_v16  ;;  %v1676_v63 = vld [vmem:[%s2274_s1 + $0x80] sm:$0xff]   ;;  %v234_v2 = vld [vmem:[%s2273_s0 + $0x18] sm:$0xff]  ;;  %v233_v6 = vld [vmem:[%s2273_s0 + $0x10] sm:$0xff] }
  0x39   :  { %v1677_v1 = vld [vmem:[%s2274_s1 + $0x140] sm:$0xff]   ;;  %v242_v3 = vld [vmem:[%s2273_s0 + $0x58] sm:$0xff]  ;;  %v241_v7 = vld [vmem:[%s2273_s0 + $0x50] sm:$0xff] }
  0x3a   :  { %1544 = vmatpush3.bf16.msra.mxu0 %v1638_v17  ;;  %v250_v4 = vpack.c.bf16 %v242_v3, %v234_v2  ;;  %v1678_v5 = vld [vmem:[%s2274_s1 + $0x100] sm:$0xff]   ;;  %v1679_v8 = vld [vmem:[%s2274_s1 + $0x1f8] sm:$0xff]   ;;  %v236_v9 = vld [vmem:[%s2273_s0 + $0x28] sm:$0xff]  ;;  %v249_v11 = vpack.c.bf16 %v241_v7, %v233_v6 }
  0x3b   :  { %1545 = vmatprep.subr.bf16.mxu0 %v1862_v0  ;;  %1429 = vmatpush3.bf16.msra.mxu1 %v1640_v18  ;;  %v244_v10 = vld [vmem:[%s2273_s0 + $0x68] sm:$0xff]  ;;  %v1680_v13 = vld [vmem:[%s2274_s1 + $0x1b8] sm:$0xff]   ;;  %v235_v14 = vld [vmem:[%s2273_s0 + $0x20] sm:$0xff] }
  0x3c   :  { %1430 = vmatprep.subr.bf16.mxu1 %v1642_v19  ;;  %v252_v12 = vpack.c.bf16 %v244_v10, %v236_v9  ;;  %v243_v15 = vld [vmem:[%s2273_s0 + $0x60] sm:$0xff]  ;;  %v1681_v17 = vld [vmem:[%s2274_s1 + $0x1f0] sm:$0xff]   ;;  %v1683_v19 = vld [vmem:[%s2274_s1 + $0x1e8] sm:$0xff]  }
  0x3d   :  { %v251_v16 = vpack.c.bf16 %v243_v15, %v235_v14  ;;  %v1682_v18 = vld [vmem:[%s2274_s1 + $0x1b0] sm:$0xff]   ;;  %v238_v24 = vld [vmem:[%s2273_s0 + $0x38] sm:$0xff]  ;;  %v1692_v31 = vld [vmem:[%s2274_s1 + $0x188] sm:$0xff]  }
  0x3e   :  { %1546 = vmatpush3.bf16.msra.mxu0 %v1641_v20  ;;  %v1684_v20 = vld [vmem:[%s2274_s1 + $0x1a8] sm:$0xff]   ;;  %v246_v25 = vld [vmem:[%s2273_s0 + $0x78] sm:$0xff]  ;;  %v1689_v28 = vld [vmem:[%s2274_s1 + $0x1d0] sm:$0xff]  }
  0x3f   :  { %1547 = vmatprep.subr.bf16.mxu0 %v1862_v0  ;;  %1431 = vmatpush3.bf16.msra.mxu1 %v1643_v21  ;;  %v1685_v21 = vld [vmem:[%s2274_s1 + $0x1e0] sm:$0xff]   ;;  %v1690_v29 = vld [vmem:[%s2274_s1 + $0x190] sm:$0xff]  }
  0x40   :  { %1432 = vmatprep.subr.bf16.mxu1 %v1645_v23  ;;  %v1687_v23 = vld [vmem:[%s2274_s1 + $0x1d8] sm:$0xff]   ;;  %v1693_v32 = vld [vmem:[%s2274_s1 + $0x1c0] sm:$0xff]  }
  0x41   :  { %v1694_v33 = vld [vmem:[%s2274_s1 + $0x180] sm:$0xff]  }
  0x42   :  { %1548 = vmatpush3.bf16.msra.mxu0 %v1644_v22  ;;  %v1686_v22 = vld [vmem:[%s2274_s1 + $0x1a0] sm:$0xff]  }
  0x43   :  { %1440 = vmatprep.subr.bf16.mxu0 %v1647_v27  ;;  %1433 = vmatpush3.bf16.msra.mxu1 %v1646_v26  ;;  %v1688_v26 = vld [vmem:[%s2274_s1 + $0x198] sm:$0xff]   ;;  %v254_v27 = vpack.c.bf16 %v246_v25, %v238_v24 }
  0x44   :  { %1462 = vmatprep.subr.bf16.mxu1 %v1649_v35  ;;  %v245_v35 = vld [vmem:[%s2273_s0 + $0x70] sm:$0xff] }
  0x45   :  { %1550 = vmatmul.mubr.bf16.vlgmr.msra.gmra.mxu0 %v117_v34  ;;  %v237_v34 = vld [vmem:[%s2273_s0 + $0x30] sm:$0xff] }
  0x46   :  { %1441 = vmatpush3.bf16.msra.mxu0 %v1648_v30  ;;  %800 = vmatmul.mubr.bf16.vlgmr.msra.gmra.mxu1 %v247_v37  ;;  %v1691_v30 = vld [vmem:[%s2274_s1 + $0x1c8] sm:$0xff]  }
  0x47   :  { %1442 = vmatprep.subr.bf16.mxu0 %v1651_v38  ;;  %1463 = vmatpush3.bf16.msra.mxu1 %v1650_v36  ;;  %v253_v36 = vpack.c.bf16 %v245_v35, %v237_v34 }
  0x48   :  { %1464 = vmatprep.subr.bf16.mxu1 %v1653_v40  ;;  %840 = vmatprep.mubr.bf16.mxu0 %v250_v4 }
  0x49   :  { %881 = vmatprep.mubr.bf16.mxu1 %v252_v12 }
  0x4a   :  { %1443 = vmatpush3.bf16.msra.mxu0 %v1652_v39 }
  0x4b   :  { %1444 = vmatprep.subr.bf16.mxu0 %v1655_v42  ;;  %1465 = vmatpush3.bf16.msra.mxu1 %v1654_v41 }
  0x4c   :  { %1466 = vmatprep.subr.bf16.mxu1 %v1657_v44 }
  0x4e   :  { %1445 = vmatpush3.bf16.msra.mxu0 %v1656_v43 }
  0x4f   :  { %1446 = vmatprep.subr.bf16.mxu0 %v1659_v46  ;;  %1467 = vmatpush3.bf16.msra.mxu1 %v1658_v45 }
  0x50   :  { %1468 = vmatprep.subr.bf16.mxu1 %v1661_v48 }
  0x52   :  { %1447 = vmatpush3.bf16.msra.mxu0 %v1660_v47 }
  0x53   :  { %1448 = vmatprep.subr.bf16.mxu0 %v1663_v50  ;;  %1469 = vmatpush3.bf16.msra.mxu1 %v1662_v49 }
  0x54   :  { %1470 = vmatprep.subr.bf16.mxu1 %v1665_v52 }
  0x56   :  { %1449 = vmatpush3.bf16.msra.mxu0 %v1664_v51 }
  0x57   :  { %1450 = vmatprep.subr.bf16.mxu0 %v1667_v54  ;;  %1471 = vmatpush3.bf16.msra.mxu1 %v1666_v53 }
  0x58   :  { %1472 = vmatprep.subr.bf16.mxu1 %v1669_v56 }
  0x5a   :  { %1451 = vmatpush3.bf16.msra.mxu0 %v1668_v55 }
  0x5b   :  { %1452 = vmatprep.subr.bf16.mxu0 %v1671_v58  ;;  %1473 = vmatpush3.bf16.msra.mxu1 %v1670_v57 }
  0x5c   :  { %1474 = vmatprep.subr.bf16.mxu1 %v1673_v60 }
  0x5e   :  { %1453 = vmatpush3.bf16.msra.mxu0 %v1672_v59 }
  0x5f   :  { %1454 = vmatprep.subr.bf16.mxu0 %v1675_v62  ;;  %1475 = vmatpush3.bf16.msra.mxu1 %v1674_v61 }
  0x60   :  { %1476 = vmatprep.subr.bf16.mxu1 %v1677_v1 }
  0x62   :  { %1455 = vmatpush3.bf16.msra.mxu0 %v1676_v63 }
  0x63   :  { %1484 = vmatprep.subr.bf16.mxu0 %v1679_v8  ;;  %1477 = vmatpush3.bf16.msra.mxu1 %v1678_v5 }
  0x65   :  { %841 = vmatmul.mubr.bf16.vlgmr.msra.gmra.mxu0 %v249_v11 }
  0x66   :  { %1485 = vmatpush3.bf16.msra.mxu0 %v1680_v13  ;;  %882 = vmatmul.mubr.bf16.vlgmr.msra.gmra.mxu1 %v251_v16 }
  0x67   :  { %1486 = vmatprep.subr.bf16.mxu0 %v1681_v17  ;;  %922 = vmatprep.mubr.bf16.mxu0 %v254_v27 }
  0x6a   :  { %1487 = vmatpush3.bf16.msra.mxu0 %v1682_v18 }
  0x6b   :  { %1488 = vmatprep.subr.bf16.mxu0 %v1683_v19 }
  0x6e   :  { %1489 = vmatpush3.bf16.msra.mxu0 %v1684_v20 }
  0x6f   :  { %1490 = vmatprep.subr.bf16.mxu0 %v1685_v21 }
  0x72   :  { %1491 = vmatpush3.bf16.msra.mxu0 %v1686_v22 }
  0x73   :  { %1492 = vmatprep.subr.bf16.mxu0 %v1687_v23 }
  0x76   :  { %1493 = vmatpush3.bf16.msra.mxu0 %v1688_v26 }
  0x77   :  { %1494 = vmatprep.subr.bf16.mxu0 %v1689_v28 }
  0x7a   :  { %1495 = vmatpush3.bf16.msra.mxu0 %v1690_v29 }
  0x7b   :  { %1496 = vmatprep.subr.bf16.mxu0 %v1691_v30 }
  0x7e   :  { %1497 = vmatpush3.bf16.msra.mxu0 %v1692_v31 }
  0x7f   :  { %1498 = vmatprep.subr.bf16.mxu0 %v1693_v32 }
  0x82   :  { %1499 = vmatpush3.bf16.msra.mxu0 %v1694_v33 }
  0x85   :  { %923 = vmatmul.mubr.bf16.vlgmr.msra.gmra.mxu0 %v253_v36 }
  0x86   :  { %1806 = shalt.err (!%p1803_p5)  }
  0x87   :  { %90 = dma.hbm_to_vmem [thread:$0]  %s2281_s8, 1024, %s88_s27, [#allocation7] }
  0x88   :  { %s1815_s0 = scalar_lea.vmem %s100_s29, 1024  ;;  %p1820_p7 = scmp.lt.s32.totalorder %s100_s29, %s100_s29 }
  0x89   :  { %p1816_p6 = scmp.ne.s32.totalorder %s100_s29, %s1815_s0  ;;  %p1821_p8 = scmp.lt.s32.totalorder %s1815_s0, %s1815_s0 }
  0x8b   :  { %p1822_p9 = por %p1821_p8, %p1820_p7 }
  0x8d   :  { %p1823_p10 = pnand %p1822_p9, %p1816_p6 }
  0x8f   :  { %1826 = shalt.err (!%p1823_p10)  }
  0x90   :  { %102 = dma.hbm_to_vmem [thread:$0]  %s2282_s9, 1024, %s100_s29, [#allocation7 + $0x1] }
  0x91   :  { %s1866_s5 = smov [#allocation6]  }
  0x92   :  { %s111_s14 = sshll.u32 %s1866_s5, 4  ;;  %s112_s14 = int_to_ptr.vmem [resolvable:$true] %s111_s14 }
  0x93   :  { %s1835_s15 = scalar_lea.vmem %s112_s14, 1024  ;;  %p1840_p12 = scmp.lt.s32.totalorder %s112_s14, %s112_s14 }
  0x94   :  { %p1836_p11 = scmp.ne.s32.totalorder %s112_s14, %s1835_s15  ;;  %p1841_p13 = scmp.lt.s32.totalorder %s1835_s15, %s1835_s15 }
  0x96   :  { %p1842_p0 = por %p1841_p13, %p1840_p12 }
  0x98   :  { %p1843_p1 = pnand %p1842_p0, %p1836_p11 }
  0x9a   :  { %1846 = shalt.err (!%p1843_p1)  }
  0x9b   :  { %114 = dma.hbm_to_vmem [thread:$0]  %s2283_s10, 1024, %s112_s14, [#allocation7 + $0x2]  ;;  %v134_v37 = vld [vmem:[#allocation8] sm:$0xff]  ;;  %v135_v41 = vld [vmem:[#allocation8 + $0x8] sm:$0xff] }
 0x105   :  { %v218_v38 = vpop.f32.mrf.mxu0 }
 0x106   :  { %v219_v39 = vadd.f32 %v218_v38, %v134_v37  ;;  %v1434_v47 = vpop.f32.mrf.mxu1 }
 0x107   :  { %v1551_v40 = vpop.f32.mrf.mxu0 }
 0x108   :  { %1695 = vtanh.f32 %v219_v39  ;;  %v1435_v48 = vpop.f32.mrf.mxu1 }
 0x109   :  { %v221_v42 = vpop.f32.mrf.mxu0  ;;  %v1436_v59 = vadd.f32 %v1435_v48, %v1434_v47 }
 0x10a   :  { %v222_v43 = vadd.f32 %v221_v42, %v135_v41  ;;  %v1437_v49 = vpop.f32.mrf.mxu1 }
 0x10b   :  { %v1552_v44 = vpop.f32.mrf.mxu0 }
 0x10c   :  { %1697 = vtanh.f32 %v222_v43  ;;  %v1438_v50 = vpop.f32.mrf.mxu1 }
 0x10d   :  { %v1439_v2 = vadd.f32 %v1438_v50, %v1437_v49 }
 0x115   :  { %v2225_v45 = vpop.eup %1695 }
 0x119   :  { %v2227_v46 = vpop.eup %1697 }
 0x125   :  { %v1456_v51 = vpop.f32.mrf.mxu0 }
 0x126   :  { %v1478_v53 = vpop.f32.mrf.mxu1 }
 0x127   :  { %v1457_v52 = vpop.f32.mrf.mxu0 }
 0x128   :  { %v1479_v55 = vpop.f32.mrf.mxu1  ;;  %v1458_v56 = vadd.f32 %v1457_v52, %v1456_v51 }
 0x129   :  { %v1459_v54 = vpop.f32.mrf.mxu0  ;;  %v1480_v61 = vadd.f32 %v1479_v55, %v1478_v53 }
 0x12a   :  { %v1481_v58 = vpop.f32.mrf.mxu1  ;;  %v843_v60 = vadd.f32 %v1458_v56, %v1436_v59 }
 0x12b   :  { %v1460_v57 = vpop.f32.mrf.mxu0 }
 0x12c   :  { %v1461_v62 = vadd.f32 %v1460_v57, %v1459_v54  ;;  %v1482_v63 = vpop.f32.mrf.mxu1  ;;  %v884_v4 = vadd.f32 %v1480_v61, %v843_v60 }
 0x12d   :  { %v1483_v6 = vadd.f32 %v1482_v63, %v1481_v58 }
 0x12e   :  { %v846_v5 = vadd.f32 %v1461_v62, %v1439_v2 }
 0x130   :  { %v887_v11 = vadd.f32 %v1483_v6, %v846_v5 }
 0x145   :  { %v1500_v1 = vpop.f32.mrf.mxu0 }
 0x147   :  { %v1501_v3 = vpop.f32.mrf.mxu0 }
 0x148   :  { %v1502_v7 = vadd.f32 %v1501_v3, %v1500_v1 }
 0x149   :  { %v1503_v8 = vpop.f32.mrf.mxu0 }
 0x14a   :  { %v925_v9 = vadd.f32 %v1502_v7, %v884_v4 }
 0x14b   :  { %v1504_v10 = vpop.f32.mrf.mxu0 }
 0x14c   :  { %v1505_v12 = vadd.f32 %v1504_v10, %v1503_v8 }
 0x14e   :  { %v928_v13 = vadd.f32 %v1505_v12, %v887_v11 }
 0x14f   :  { %1851 = dma.done.wait [#allocation7], 1024 }
 0x150   :  { %1852 = vsyncadd [#allocation7], 4294966272 }
 0x151   :  { %1853 = dma.done.wait [#allocation7 + $0x1], 1024 }
 0x152   :  { %1854 = vsyncadd [#allocation7 + $0x1], 4294966272 }
 0x153   :  { %1855 = dma.done.wait [#allocation7 + $0x2], 1024 }
 0x154   :  { %1856 = vsyncadd [#allocation7 + $0x2], 4294966272  ;;  %1553 = vmatprep.subr.bf16.mxu1 %v1862_v0  ;;  %1573 = vmatprep.subr.bf16.mxu0 %v1862_v0  ;;  %v1699_v14 = vld [vmem:[#allocation5 + $0x38] sm:$0xff]   ;;  %v1701_v16 = vld [vmem:[#allocation5 + $0x30] sm:$0xff]   ;;  %v975_v34 = vpack.c.bf16 %v2227_v46, %v2225_v45 }
 0x155   :  { %1569 = vmatprep.mubr.msk.bf16.mxu1 %vm1863_vm0, %v1862_v0  ;;  %1589 = vmatprep.mubr.msk.bf16.mxu0 %vm1863_vm0, %v1862_v0  ;;  %v1700_v15 = vld [vmem:[#allocation4 + $0x38] sm:$0xff]   ;;  %v1702_v17 = vld [vmem:[#allocation4 + $0x30] sm:$0xff]   ;;  %v1703_v18 = vld [vmem:[#allocation5 + $0x28] sm:$0xff]  }
 0x156   :  { %1554 = vmatpush3.bf16.msra.mxu1 %v1699_v14  ;;  %1574 = vmatpush3.bf16.msra.mxu0 %v1700_v15  ;;  %v1704_v19 = vld [vmem:[#allocation4 + $0x28] sm:$0xff]   ;;  %v1705_v20 = vld [vmem:[#allocation5 + $0x20] sm:$0xff]   ;;  %v1707_v22 = vld [vmem:[#allocation5 + $0x18] sm:$0xff]  }
 0x157   :  { %1555 = vmatprep.subr.bf16.mxu1 %v1862_v0  ;;  %1575 = vmatprep.subr.bf16.mxu0 %v1862_v0  ;;  %v1706_v21 = vld [vmem:[#allocation4 + $0x20] sm:$0xff]   ;;  %v1708_v23 = vld [vmem:[#allocation4 + $0x18] sm:$0xff]   ;;  %v951_v25 = vld [vmem:[%s2277_s4 + $0x8] sm:$0xff] }
 0x158   :  { %v950_v24 = vld [vmem:[%s2277_s4] sm:$0xff]  ;;  %v953_v27 = vadd.f32 %v951_v25, %v928_v13  ;;  %v1709_v28 = vld [vmem:[#allocation5 + $0x10] sm:$0xff]   ;;  %v1711_v30 = vld [vmem:[#allocation5 + $0x8] sm:$0xff]  }
 0x159   :  { %v952_v26 = vadd.f32 %v950_v24, %v925_v9  ;;  %v1710_v29 = vld [vmem:[#allocation4 + $0x10] sm:$0xff]   ;;  %v1712_v31 = vld [vmem:[#allocation4 + $0x8] sm:$0xff]   ;;  %v1713_v32 = vld [vmem:[#allocation5] sm:$0xff]  }
 0x15a   :  { %1556 = vmatpush3.bf16.msra.mxu1 %v1701_v16  ;;  %1576 = vmatpush3.bf16.msra.mxu0 %v1702_v17  ;;  %v1714_v33 = vld [vmem:[#allocation4] sm:$0xff]   ;;  %v1715_v35 = vld [vmem:[#allocation6 + $0x38] sm:$0xff]   ;;  %v1716_v39 = vld [vmem:[#allocation6 + $0x30] sm:$0xff]  }
 0x15b   :  { %1557 = vmatprep.subr.bf16.mxu1 %v1862_v0  ;;  %1577 = vmatprep.subr.bf16.mxu0 %v1862_v0  ;;  %1723 = vtanh.f32 %v952_v26  ;;  %v1717_v40 = vld [vmem:[#allocation6 + $0x28] sm:$0xff]   ;;  %v1718_v41 = vld [vmem:[#allocation6 + $0x20] sm:$0xff]   ;;  %v1719_v42 = vld [vmem:[#allocation6 + $0x18] sm:$0xff]  }
 0x15c   :  { %1725 = vtanh.f32 %v953_v27  ;;  %v1720_v43 = vld [vmem:[#allocation6 + $0x10] sm:$0xff]   ;;  %v1721_v44 = vld [vmem:[#allocation6 + $0x8] sm:$0xff]   ;;  %v1722_v45 = vld [vmem:[#allocation6] sm:$0xff]  }
 0x15d   :  { %v1170_v53 = vld [vmem:[#allocation10] sm:$0xff]  ;;  %v1171_v55 = vld [vmem:[#allocation10 + $0x8] sm:$0xff]  ;;  %v1191_v61 = vld [vmem:[#allocation12] sm:$0xff] }
 0x15e   :  { %1558 = vmatpush3.bf16.msra.mxu1 %v1703_v18  ;;  %1578 = vmatpush3.bf16.msra.mxu0 %v1704_v19  ;;  %v1192_v1 = vld [vmem:[#allocation12 + $0x8] sm:$0xff] }
 0x15f   :  { %1559 = vmatprep.subr.bf16.mxu1 %v1862_v0  ;;  %1579 = vmatprep.subr.bf16.mxu0 %v1862_v0 }
 0x162   :  { %1560 = vmatpush3.bf16.msra.mxu1 %v1705_v20  ;;  %1580 = vmatpush3.bf16.msra.mxu0 %v1706_v21 }
 0x163   :  { %1561 = vmatprep.subr.bf16.mxu1 %v1862_v0  ;;  %1581 = vmatprep.subr.bf16.mxu0 %v1862_v0 }
 0x166   :  { %1562 = vmatpush3.bf16.msra.mxu1 %v1707_v22  ;;  %1582 = vmatpush3.bf16.msra.mxu0 %v1708_v23 }
 0x167   :  { %1563 = vmatprep.subr.bf16.mxu1 %v1862_v0  ;;  %1583 = vmatprep.subr.bf16.mxu0 %v1862_v0 }
 0x168   :  { %v1724_v36 = vpop.eup %1723 }
 0x169   :  { %v1726_v37 = vpop.eup %1725 }
 0x16a   :  { %1564 = vmatpush3.bf16.msra.mxu1 %v1709_v28  ;;  %1584 = vmatpush3.bf16.msra.mxu0 %v1710_v29  ;;  %v956_v38 = vpack.c.bf16 %v1726_v37, %v1724_v36 }
 0x16b   :  { %1565 = vmatprep.subr.bf16.mxu1 %v1862_v0  ;;  %1585 = vmatprep.subr.bf16.mxu0 %v1862_v0 }
 0x16e   :  { %1566 = vmatpush3.bf16.msra.mxu1 %v1711_v30  ;;  %1586 = vmatpush3.bf16.msra.mxu0 %v1712_v31 }
 0x16f   :  { %1567 = vmatprep.subr.bf16.mxu1 %v1862_v0  ;;  %1587 = vmatprep.subr.bf16.mxu0 %v1862_v0 }
 0x172   :  { %1568 = vmatpush3.bf16.msra.mxu1 %v1713_v32  ;;  %1588 = vmatpush3.bf16.msra.mxu0 %v1714_v33 }
 0x173   :  { %1593 = vmatprep.subr.bf16.mxu1 %v1862_v0 }
 0x175   :  { %1570 = vmatmul.mubr.bf16.vlgmr.msra.gmra.mxu1 %v975_v34  ;;  %1590 = vmatmul.mubr.bf16.vlgmr.msra.gmra.mxu0 %v956_v38 }
 0x176   :  { %1594 = vmatpush3.bf16.msra.mxu1 %v1715_v35  ;;  %1609 = vmatprep.mubr.msk.bf16.mxu1 %vm1863_vm0, %v1862_v0 }
 0x177   :  { %1595 = vmatprep.subr.bf16.mxu1 %v1862_v0 }
 0x17a   :  { %1596 = vmatpush3.bf16.msra.mxu1 %v1716_v39 }
 0x17b   :  { %1597 = vmatprep.subr.bf16.mxu1 %v1862_v0 }
 0x17e   :  { %1598 = vmatpush3.bf16.msra.mxu1 %v1717_v40 }
 0x17f   :  { %1599 = vmatprep.subr.bf16.mxu1 %v1862_v0 }
 0x182   :  { %1600 = vmatpush3.bf16.msra.mxu1 %v1718_v41 }
 0x183   :  { %1601 = vmatprep.subr.bf16.mxu1 %v1862_v0 }
 0x186   :  { %1602 = vmatpush3.bf16.msra.mxu1 %v1719_v42 }
 0x187   :  { %1603 = vmatprep.subr.bf16.mxu1 %v1862_v0 }
 0x18a   :  { %1604 = vmatpush3.bf16.msra.mxu1 %v1720_v43 }
 0x18b   :  { %1605 = vmatprep.subr.bf16.mxu1 %v1862_v0 }
 0x18e   :  { %1606 = vmatpush3.bf16.msra.mxu1 %v1721_v44 }
 0x18f   :  { %1607 = vmatprep.subr.bf16.mxu1 %v1862_v0 }
 0x192   :  { %1608 = vmatpush3.bf16.msra.mxu1 %v1722_v45 }
 0x235   :  { %v1074_v46 = vpop.f32.mrf.mxu1  ;;  %v1163_v48 = vpop.f32.mrf.mxu0 }
 0x236   :  { %v1164_v51 = vadd.f32 %v1163_v48, %v1074_v46 }
 0x237   :  { %v1571_v47 = vpop.f32.mrf.mxu1  ;;  %v1591_v50 = vpop.f32.mrf.mxu0 }
 0x238   :  { %v1172_v58 = vadd.f32 %v1170_v53, %v1164_v51 }
 0x239   :  { %v1077_v49 = vpop.f32.mrf.mxu1  ;;  %v1166_v54 = vpop.f32.mrf.mxu0 }
 0x23a   :  { %v1167_v56 = vadd.f32 %v1166_v54, %v1077_v49 }
 0x23b   :  { %v1572_v52 = vpop.f32.mrf.mxu1  ;;  %v1592_v57 = vpop.f32.mrf.mxu0 }
 0x23c   :  { %v1173_v59 = vadd.f32 %v1171_v55, %v1167_v56 }
 0x23e   :  { %v1174_v60 = vpack.c.bf16 %v1173_v59, %v1172_v58 }
 0x240   :  { %1610 = vmatmul.mubr.bf16.vlgmr.msra.gmra.mxu1 %v1174_v60 }
 0x300   :  { %v1275_v0 = vpop.f32.mrf.mxu1 }
 0x301   :  { %v1276_v62 = vadd.f32 %v1275_v0, %v1191_v61 }
 0x302   :  { %v1611_v63 = vpop.f32.mrf.mxu1 }
 0x303   :  { %1282 = vst [vmem:[%s2284_s11] sm:$0xff] %v1276_v62 }
 0x304   :  { %v1278_v2 = vpop.f32.mrf.mxu1 }
 0x305   :  { %v1279_v3 = vadd.f32 %v1278_v2, %v1192_v1 }
 0x306   :  { %v1612_v4 = vpop.f32.mrf.mxu1 }
 0x307   :  { %1283 = vst [vmem:[%s2284_s11 + $0x8] sm:$0xff] %v1279_v3 }
 0x308   :  { %1288 = vsyncpa [#allocation9], 1 }
 0x309   :  { %1289 = vsyncpa [#allocation11], 1 }
 0x30a   :  { %1290 = vsyncmov [#allocation7] }
 0x30d   :  { %s1291_s3 = vpop.sfrf %1290 }
 0x30e   :  { %p1406_p2 = scmp.ne.s32.totalorder %s1291_s3, 0 }
 0x310   :  { %1295 = shalt.err (%p1406_p2)  }
 0x311   :  { %1297 = vsyncmov [#allocation7 + $0x1] }
 0x314   :  { %s1298_s21 = vpop.sfrf %1297 }
 0x315   :  { %p1407_p3 = scmp.ne.s32.totalorder %s1298_s21, 0 }
 0x317   :  { %1302 = shalt.err (%p1407_p3)  }
 0x318   :  { %1304 = vsyncmov [#allocation7 + $0x2] }
 0x31b   :  { %s1305_s22 = vpop.sfrf %1304 }
 0x31c   :  { %p1408_p4 = scmp.ne.s32.totalorder %s1305_s22, 0 }
 0x31e   :  { %1309 = shalt.err (%p1408_p4)  }

</bundles_post_ra>
